<compile_context>
chip_gen: v6e
topology: v6e:2x2x1
jax: 0.10.0
libtpu: 0.0.40
codegen_flags: <defaults>
</compile_context>

<pallas_src>
import jax
import jax.numpy as jnp
from jax import lax
from jax.experimental import pallas as pl
from jax.experimental.pallas import tpu as pltpu
import numpy as np

# ---------------- configuration (small, consistent with the module) ----------
N, C_IN, H, W = 2, 4, 16, 16          # input NCHW
C_FEAT = 32                           # backbone feature channels
NUM_CLASSES = 8                       # head output channels
RESIZE = (16, 16)                     # F.interpolate target size
HF, WF = H // 2, W // 2               # backbone stride-2 output spatial
HO, WO = RESIZE

KIN = 9 * C_IN + 1                    # im2col rows + ones row (bias fold) = 37
WC_ROWS = C_FEAT + 1                  # conv weight rows + ones-passthrough = 33
WH_ROW0 = ((WC_ROWS + 7) // 8) * 8    # sublane-aligned start of head weight = 40
WPACK_ROWS = WH_ROW0 + NUM_CLASSES    # packed parameter buffer rows = 48

# Set to jnp.bfloat16 on v6e/v7x for fewer MXU passes / fewer DMA bytes
# (accumulation stays f32; correctness tolerance is loosened automatically).
MXU_DTYPE = jnp.float32


# ---------------- fused Pallas kernel -----------------------------------------
def fused_seg_kernel(a_ref, wp_ref, mt_ref, o_ref):
    """Fused backbone-conv GEMM + ReLU + 1x1 head + bilinear resize (bias folded).

    a_ref : (9*Cin+1, N*Hf*Wf) = (37, 128)  im2col + ones row, batch in lane axis
                                            (column index = n*Hf*Wf + s)
    wp_ref: (48, 37)  packed params: rows [0:33]  = [conv weight | conv bias]
                                                     + ones-passthrough row,
                                     rows [40:48] = [head weight | head bias]
                                                     in columns [0:33]
    mt_ref: (Hf*Wf, Ho*Wo) = (64, 256)      transposed bilinear matrix M^T
    o_ref : (N*K, Ho*Wo)   = (16, 256)      logits, n-major rows, lane-dense
    """
    wc = wp_ref[:WC_ROWS, :]                                   # (33, 37)
    wh = wp_ref[WH_ROW0:WH_ROW0 + NUM_CLASSES, :WC_ROWS]       # (8, 33)
    a = a_ref[...]                                             # (37, 128)

    # Conv GEMM (bias folded) + ReLU; passthrough row keeps a ones row in feat
    # (ReLU(1) = 1), which carries the head bias through the next GEMM.
    feat = jnp.maximum(jnp.dot(wc, a, preferred_element_type=jnp.float32), 0.0)
    feat = feat.astype(a.dtype)                                # (33, 128)

    # 1x1 head GEMM (head bias folded via the ones row / bias column).
    tmp = jnp.dot(wh, feat, preferred_element_type=jnp.float32)  # (8, 128)

    # Rearrange lanes -> rows: (K, N*HfWf) -> (N*K, HfWf) with n-major rows,
    # via static lane slices + sublane concat (no XLU transpose needed).
    tmp_r = jnp.concatenate(
        [tmp[:, n * (HF * WF):(n + 1) * (HF * WF)] for n in range(N)], axis=0)
    tmp_r = tmp_r.astype(mt_ref.dtype)                         # (16, 64)

    # Single resize GEMM -> single unmasked 256-lane store, already NCHW-flat.
    o_ref[...] = jnp.dot(tmp_r, mt_ref[...],
                         preferred_element_type=jnp.float32)   # (16, 256)


# ---------------- wrappers -----------------------------------------------------
def _im2col_batched(x_nchw):
    """Conv2d(Cin, Cf, 3, stride=2, pad=1) patches, batch folded into lanes.

    Returns (9*Cin + 1, N*Hf*Wf): row = (ky*3+kx)*Cin + cin, last row = ones
    (for the conv-bias fold); column = n*Hf*Wf + s.  These tiny pad/slice/stack
    ops fuse into one XLA producer fusion feeding the pallas_call.
    """
    xp = jnp.pad(x_nchw, ((0, 0), (0, 0), (1, 1), (1, 1)))
    cols = [xp[:, :, ky:ky + 2 * HF:2, kx:kx + 2 * WF:2]
            for ky in range(3) for kx in range(3)]            # each (N, Cin, Hf, Wf)
    a = jnp.stack(cols, axis=1).reshape(N, 9 * C_IN, HF * WF)  # (N, 36, 64)
    a = jnp.transpose(a, (1, 0, 2)).reshape(9 * C_IN, N * HF * WF)  # (36, 128)
    ones = jnp.ones((1, N * HF * WF), a.dtype)
    return jnp.concatenate([a, ones], axis=0)                  # (37, 128)


@jax.jit
def segmentation_model(x_nchw, wpack, mt):
    a = _im2col_batched(x_nchw).astype(MXU_DTYPE)
    out_flat = pl.pallas_call(
        fused_seg_kernel,
        out_shape=jax.ShapeDtypeStruct((N * NUM_CLASSES, HO * WO), jnp.float32),
        grid=(1,),   # single grid step: all work in one launch, no HBM round-trip
        in_specs=[
            pl.BlockSpec((KIN, N * HF * WF), lambda i: (0, 0)),
            pl.BlockSpec((WPACK_ROWS, KIN), lambda i: (0, 0)),
            pl.BlockSpec((HF * WF, HO * WO), lambda i: (0, 0)),
        ],
        out_specs=pl.BlockSpec((N * NUM_CLASSES, HO * WO), lambda i: (0, 0)),
        compiler_params=pltpu.CompilerParams(
            dimension_semantics=("arbitrary",)),
    )(a, wpack, mt)
    # Rows are n-major (n*K + k): pure reshape to NCHW, no transpose.
    return out_flat.reshape(N, NUM_CLASSES, HO, WO)


def bilinear_matrix(out_size, in_size):
    """Row-stochastic bilinear interp matrix, PyTorch align_corners=False."""
    scale = in_size / out_size
    dst = np.arange(out_size, dtype=np.float64)
    src = np.clip((dst + 0.5) * scale - 0.5, 0.0, in_size - 1)
    i0 = np.floor(src).astype(np.int64)
    i1 = np.minimum(i0 + 1, in_size - 1)
    w1 = src - i0
    w0 = 1.0 - w1
    m = np.zeros((out_size, in_size), dtype=np.float64)
    m[np.arange(out_size), i0] += w0
    m[np.arange(out_size), i1] += w1
    return m


def pack_params(w_conv, b_conv, w_head_kc, b_head):
    """Pack [conv weight|bias + passthrough] and [head weight|bias] into one buffer."""
    wc = jnp.transpose(w_conv, (0, 2, 3, 1)).reshape(C_FEAT, 9 * C_IN)  # (Cf, 36)
    wpack = jnp.zeros((WPACK_ROWS, KIN), jnp.float32)
    wpack = wpack.at[:C_FEAT, :9 * C_IN].set(wc)
    wpack = wpack.at[:C_FEAT, 9 * C_IN].set(b_conv)          # conv bias column
    wpack = wpack.at[C_FEAT, 9 * C_IN].set(1.0)              # ones-passthrough row
    wpack = wpack.at[WH_ROW0:WH_ROW0 + NUM_CLASSES, :C_FEAT].set(w_head_kc)
    wpack = wpack.at[WH_ROW0:WH_ROW0 + NUM_CLASSES, C_FEAT].set(b_head)  # head bias
    return wpack.astype(MXU_DTYPE)


# ---------------- pure-JAX reference (correctness check) ----------------------
def reference_model(x_nchw, w_conv, b_conv, w_head_kc, b_head, m2d):
    """Module order (conv -> ReLU -> resize -> head); kernel reorders head first."""
    feat = lax.conv_general_dilated(
        x_nchw, w_conv, window_strides=(2, 2), padding=((1, 1), (1, 1)),
        dimension_numbers=("NCHW", "OIHW", "NCHW"))
    feat = jax.nn.relu(feat + b_conv[None, :, None, None])           # (N, Cf, Hf, Wf)
    f = feat.reshape(N, C_FEAT, HF * WF)
    resized = jnp.einsum("op,ncp->nco", m2d, f)                      # (N, Cf, Ho*Wo)
    logits = (jnp.einsum("kc,nco->nko", w_head_kc, resized)
              + b_head[None, :, None])
    return logits.reshape(N, NUM_CLASSES, HO, WO)


# ---------------- main ---------------------------------------------------------
if __name__ == "__main__":
    key = jax.random.PRNGKey(0)
    kx_, kw1, kb1, kw2, kb2 = jax.random.split(key, 5)

    x = jax.random.normal(kx_, (N, C_IN, H, W), dtype=jnp.float32)

    # Deterministic synthetic parameters (PyTorch Conv2d weight layouts).
    w_conv = jax.random.normal(kw1, (C_FEAT, C_IN, 3, 3), jnp.float32) * 0.1
    b_conv = jax.random.normal(kb1, (C_FEAT,), jnp.float32) * 0.1
    w_head_oihw = jax.random.normal(kw2, (NUM_CLASSES, C_FEAT, 1, 1), jnp.float32) * 0.1
    b_head = jax.random.normal(kb2, (NUM_CLASSES,), jnp.float32) * 0.1
    w_head_kc = w_head_oihw[:, :, 0, 0]                              # (K, Cf)

    # Precomputed bilinear matrix M = kron(Mh, Mw): (Ho*Wo, Hf*Wf).
    m2d = jnp.asarray(np.kron(bilinear_matrix(HO, HF),
                              bilinear_matrix(WO, WF)), dtype=jnp.float32)
    mt = jnp.asarray(np.asarray(m2d).T).astype(MXU_DTYPE)            # (Hf*Wf, Ho*Wo)

    # Kernel-ready packed parameters (computed once, outside jit).
    wpack = pack_params(w_conv, b_conv, w_head_kc, b_head)

    logits = jax.block_until_ready(segmentation_model(x, wpack, mt))
    ref = jax.block_until_ready(
        reference_model(x, w_conv, b_conv, w_head_kc, b_head, m2d))

    tol = 1e-4 if MXU_DTYPE == jnp.float32 else 2e-2
    assert logits.shape == (N, NUM_CLASSES, HO, WO), logits.shape
    np.testing.assert_allclose(np.asarray(logits), np.asarray(ref),
                               rtol=tol, atol=tol)
    print("KERNEL_OK")
</pallas_src>

<mosaic_0001>
module attributes {stable_mosaic.version = 11 : i64} {
  func.func @fused_seg_kernel(%arg0: i32, %arg1: memref<37x128xf32, #tpu.memory_space<vmem>>, %arg2: memref<48x37xf32, #tpu.memory_space<vmem>>, %arg3: memref<64x256xf32, #tpu.memory_space<vmem>>, %arg4: memref<16x256xf32, #tpu.memory_space<vmem>>) attributes {dimension_semantics = [#tpu.dimension_semantics<arbitrary>], iteration_bounds = array<i64: 1>, scalar_prefetch = 0 : i64, scratch_operands = 0 : i64, tpu.core_type = #tpu.core_type<tc>, window_params = [{pipeline_mode = #tpu.pipeline_mode<synchronous>, transform_indices = @transform_0, window_bounds = array<i64: 37, 128>}, {pipeline_mode = #tpu.pipeline_mode<synchronous>, transform_indices = @transform_1, window_bounds = array<i64: 48, 37>}, {pipeline_mode = #tpu.pipeline_mode<synchronous>, transform_indices = @transform_2, window_bounds = array<i64: 64, 256>}, {pipeline_mode = #tpu.pipeline_mode<synchronous>, transform_indices = @transform_3, window_bounds = array<i64: 16, 256>}]} {
    %c0 = arith.constant 0 : index
    %c0_0 = arith.constant 0 : index
    %0 = vector.load %arg2[%c0, %c0_0] : memref<48x37xf32, #tpu.memory_space<vmem>>, vector<33x37xf32>
    %c40 = arith.constant 40 : index
    %c0_1 = arith.constant 0 : index
    %1 = vector.load %arg2[%c40, %c0_1] : memref<48x37xf32, #tpu.memory_space<vmem>>, vector<8x33xf32>
    %c0_2 = arith.constant 0 : index
    %c0_3 = arith.constant 0 : index
    %2 = vector.load %arg1[%c0_2, %c0_3] : memref<37x128xf32, #tpu.memory_space<vmem>>, vector<37x128xf32>
    %cst = arith.constant dense<0.000000e+00> : vector<33x128xf32>
    %3 = tpu.matmul %0, %2, %cst {dimension_numbers = #tpu.dot_dimension_numbers<[1], [0], [0], [1], [0, 0, 1, 1], [], []>} : vector<33x37xf32>, vector<37x128xf32>, vector<33x128xf32> -> vector<33x128xf32>
    %cst_4 = arith.constant 0.000000e+00 : f32
    %4 = vector.broadcast %cst_4 : f32 to vector<33x128xf32>
    %5 = arith.maximumf %3, %4 : vector<33x128xf32>
    %cst_5 = arith.constant dense<0.000000e+00> : vector<8x128xf32>
    %6 = tpu.matmul %1, %5, %cst_5 {dimension_numbers = #tpu.dot_dimension_numbers<[1], [0], [0], [1], [0, 0, 1, 1], [], []>} : vector<8x33xf32>, vector<33x128xf32>, vector<8x128xf32> -> vector<8x128xf32>
    %7 = vector.extract_strided_slice %6 {offsets = [0, 0], sizes = [8, 64], strides = [1, 1]} : vector<8x128xf32> to vector<8x64xf32>
    %8 = vector.extract_strided_slice %6 {offsets = [0, 64], sizes = [8, 64], strides = [1, 1]} : vector<8x128xf32> to vector<8x64xf32>
    %9 = tpu.concatenate %7, %8 in 0 : vector<8x64xf32>, vector<8x64xf32> -> vector<16x64xf32>
    %c0_6 = arith.constant 0 : index
    %c0_7 = arith.constant 0 : index
    %10 = vector.load %arg3[%c0_6, %c0_7] : memref<64x256xf32, #tpu.memory_space<vmem>>, vector<64x256xf32>
    %cst_8 = arith.constant dense<0.000000e+00> : vector<16x256xf32>
    %11 = tpu.matmul %9, %10, %cst_8 {dimension_numbers = #tpu.dot_dimension_numbers<[1], [0], [0], [1], [0, 0, 1, 1], [], []>} : vector<16x64xf32>, vector<64x256xf32>, vector<16x256xf32> -> vector<16x256xf32>
    %c0_9 = arith.constant 0 : index
    %c0_10 = arith.constant 0 : index
    %12 = vector.load %arg4[%c0_9, %c0_10] : memref<16x256xf32, #tpu.memory_space<vmem>>, vector<16x256xf32>
    tpu.vector_store %arg4[%c0_9, %c0_10], %11 {strides = array<i32>} : memref<16x256xf32, #tpu.memory_space<vmem>>, vector<16x256xf32>,
    return
  }
  func.func @transform_0(%arg0: i32) -> (i32, i32) {
    %c0_i32 = arith.constant 0 : i32
    %c0_i32_0 = arith.constant 0 : i32
    %c0_i32_1 = arith.constant 0 : i32
    return %c0_i32, %c0_i32_0 : i32, i32
  }
  func.func @transform_1(%arg0: i32) -> (i32, i32) {
    %c0_i32 = arith.constant 0 : i32
    %c0_i32_0 = arith.constant 0 : i32
    %c0_i32_1 = arith.constant 0 : i32
    return %c0_i32, %c0_i32_0 : i32, i32
  }
  func.func @transform_2(%arg0: i32) -> (i32, i32) {
    %c0_i32 = arith.constant 0 : i32
    %c0_i32_0 = arith.constant 0 : i32
    %c0_i32_1 = arith.constant 0 : i32
    return %c0_i32, %c0_i32_0 : i32, i32
  }
  func.func @transform_3(%arg0: i32) -> (i32, i32) {
    %c0_i32 = arith.constant 0 : i32
    %c0_i32_0 = arith.constant 0 : i32
    %c0_i32_1 = arith.constant 0 : i32
    return %c0_i32, %c0_i32_0 : i32, i32
  }
}

</mosaic_0001>

<bundles_post_ra>
// kernel: segmentation_model.1
= control target key start
LH: loop header
LB: loop body
LE: loop exit
PB: predicated region body
PF: predicated region fallthrough
CT: control target
= control target key end

     0   :  { %vm41_vm0 = vcmask 1044480   ;;  %v394_v0 = vmov 0.0   ;;  %vm395_vm1 = vmmov 0   ;;  %vm25_vm2 = vcmask 302080   ;;  %s396_s9 = smov 64   ;;  %s534_s0 = inlined_call_operand.vmem [shape: f32[37,128], index: 0, kind: input, shape index: {}]   ;;  %s535_s1 = inlined_call_operand.vmem [shape: f32[48,37], index: 1, kind: input, shape index: {}]   ;;  %s536_s2 = inlined_call_operand.vmem [shape: f32[64,256], index: 2, kind: input, shape index: {}]   ;;  %s537_s3 = inlined_call_operand.vmem [shape: f32[16,256], index: 3, kind: output, shape index: {}]  }
   0x1   :  { %353 = vmatprep.subr.mxu0 %v394_v0  ;;  %v24_v1 = vld [vmem:[%s534_s0 + $0x20] sm:$0x1f]  ;;  %v23_v2 = vld [vmem:[%s534_s0 + $0x18] sm:$0xff]  ;;  %363 = vmatprep.mubr.msk.f32.mxu0 %vm395_vm1, %v394_v0  ;;  %v22_v3 = vld [vmem:[%s534_s0 + $0x10] sm:$0xff]  ;;  %vm144_vm3 = vcmask 1040384   ;;  %vm140_vm4 = vcmask 269312  }
   0x2   :  { %354 = vmatpush3.msk.msra.mxu0 %vm41_vm0, %v24_v1  ;;  %378 = vmatprep.subr.mxu1 %v394_v0  ;;  %v21_v4 = vld [vmem:[%s534_s0 + $0x8] sm:$0xff]  ;;  %v20_v5 = vld [vmem:[%s534_s0] sm:$0xff]  ;;  %v16_v8 = vld [vmem:[%s535_s1 + $0x10] sm:$0xff]  ;;  %vm237_vm5 = vcmask 523264  }
   0x3   :  { %355 = vmatprep.subr.mxu0 %v394_v0  ;;  %388 = vmatprep.mubr.msk.f32.mxu1 %vm395_vm1, %v394_v0  ;;  %v14_v6 = vld [vmem:[%s535_s1] sm:$0xff]  ;;  %v15_v7 = vld [vmem:[%s535_s1 + $0x8] sm:$0xff]  ;;  %v17_v9 = vld [vmem:[%s535_s1 + $0x18] sm:$0xff] }
   0x4   :  { %356 = vmatpush3.msra.mxu0 %v23_v2  ;;  %v18_v10 = vld [vmem:[%s535_s1 + $0x20] sm:$0x1]  ;;  %v19_v26 = vld [vmem:[%s535_s1 + $0x28] sm:$0xff]  ;;  %v236_v27 = vld [vmem:[%s536_s2 + $0x78] sm:$0xff] }
   0x5   :  { %357 = vmatprep.subr.mxu0 %v394_v0  ;;  %v235_v28 = vld [vmem:[%s536_s2 + $0x70] sm:$0xff]  ;;  %v234_v29 = vld [vmem:[%s536_s2 + $0x68] sm:$0xff]  ;;  %v233_v30 = vld [vmem:[%s536_s2 + $0x60] sm:$0xff] }
   0x6   :  { %358 = vmatpush3.msra.mxu0 %v22_v3  ;;  %v232_v31 = vld [vmem:[%s536_s2 + $0x58] sm:$0xff]  ;;  %v231_v32 = vld [vmem:[%s536_s2 + $0x50] sm:$0xff]  ;;  %v230_v33 = vld [vmem:[%s536_s2 + $0x48] sm:$0xff] }
   0x7   :  { %359 = vmatprep.subr.mxu0 %v394_v0  ;;  %v229_v34 = vld [vmem:[%s536_s2 + $0x40] sm:$0xff]  ;;  %v228_v35 = vld [vmem:[%s536_s2 + $0x38] sm:$0xff]  ;;  %v227_v36 = vld [vmem:[%s536_s2 + $0x30] sm:$0xff] }
   0x8   :  { %360 = vmatpush3.msra.mxu0 %v21_v4  ;;  %v226_v37 = vld [vmem:[%s536_s2 + $0x28] sm:$0xff]  ;;  %v225_v38 = vld [vmem:[%s536_s2 + $0x20] sm:$0xff]  ;;  %v224_v39 = vld [vmem:[%s536_s2 + $0x18] sm:$0xff] }
   0x9   :  { %361 = vmatprep.subr.mxu0 %v394_v0  ;;  %v223_v40 = vld [vmem:[%s536_s2 + $0x10] sm:$0xff]  ;;  %v222_v41 = vld [vmem:[%s536_s2 + $0x8] sm:$0xff]  ;;  %v221_v42 = vld [vmem:[%s536_s2] sm:$0xff] }
   0xa   :  { %362 = vmatpush3.msra.mxu0 %v20_v5 }
   0xb   :  { %364 = vmatmul.mubr.msk.f32.vlgmr.msra.gmra.mxu0 %vm25_vm2, %v14_v6 }
   0xc   :  { %366 = vmatprep.mubr.msk.f32.mxu0 %vm395_vm1, %v394_v0 }
   0xf   :  { %367 = vmatmul.mubr.msk.f32.gmra.mxu0 %vm25_vm2, %v15_v7 }
  0x10   :  { %369 = vmatprep.mubr.msk.f32.mxu0 %vm395_vm1, %v394_v0 }
  0x13   :  { %370 = vmatmul.mubr.msk.f32.gmra.mxu0 %vm25_vm2, %v16_v8 }
  0x14   :  { %372 = vmatprep.mubr.msk.f32.mxu0 %vm395_vm1, %v394_v0 }
  0x17   :  { %373 = vmatmul.mubr.msk.f32.gmra.mxu0 %vm25_vm2, %v17_v9 }
  0x18   :  { %375 = vmatprep.mubr.msk.f32.mxu0 %vm395_vm1, %v394_v0 }
  0x1b   :  { %376 = vmatmul.mubr.msk.f32.gmra.mxu0 %vm25_vm2, %v18_v10 }
  0xcb   :  { %v111_v11 = vpop.f32.mrf.mxu0 }
  0xcc   :  { %v135_v25 = vmax.f32 %v111_v11, 0.0 }
  0xcd   :  { %v365_v12 = vpop.f32.mrf.mxu0 }
  0xcf   :  { %v116_v13 = vpop.f32.mrf.mxu0 }
  0xd0   :  { %v136_v24 = vmax.f32 %v116_v13, 0.0 }
  0xd1   :  { %v368_v14 = vpop.f32.mrf.mxu0 }
  0xd3   :  { %v121_v15 = vpop.f32.mrf.mxu0 }
  0xd4   :  { %v137_v23 = vmax.f32 %v121_v15, 0.0 }
  0xd5   :  { %v371_v16 = vpop.f32.mrf.mxu0 }
  0xd7   :  { %v126_v17 = vpop.f32.mrf.mxu0 }
  0xd8   :  { %v138_v22 = vmax.f32 %v126_v17, 0.0 }
  0xd9   :  { %v374_v18 = vpop.f32.mrf.mxu0 }
  0xdb   :  { %v131_v19 = vpop.f32.mrf.mxu0 }
  0xdc   :  { %v139_v20 = vmax.f32 %v131_v19, 0.0 }
  0xdd   :  { %v377_v21 = vpop.f32.mrf.mxu0 }
  0xde   :  { %379 = vmatpush3.msk.msra.mxu1 %vm144_vm3, %v139_v20 }
  0xdf   :  { %380 = vmatprep.subr.mxu1 %v394_v0 }
  0xe0   :  { %381 = vmatpush3.msra.mxu1 %v138_v22 }
  0xe1   :  { %382 = vmatprep.subr.mxu1 %v394_v0 }
  0xe2   :  { %383 = vmatpush3.msra.mxu1 %v137_v23 }
  0xe3   :  { %384 = vmatprep.subr.mxu1 %v394_v0 }
  0xe4   :  { %385 = vmatpush3.msra.mxu1 %v136_v24 }
  0xe5   :  { %386 = vmatprep.subr.mxu1 %v394_v0 }
  0xe6   :  { %387 = vmatpush3.msra.mxu1 %v135_v25 }
  0xe7   :  { %389 = vmatmul.mubr.msk.f32.vlgmr.msra.gmra.mxu1 %vm140_vm4, %v19_v26  ;;  %258 = vmatprep.subr.mxu1 %v236_v27 }
  0xe8   :  { %259 = vmatpush1.msra.mxu1 %v235_v28  ;;  %306 = vmatprep.mubr.f32.mxu1 %v394_v0 }
  0xe9   :  { %260 = vmatprep.subr.mxu1 %v234_v29 }
  0xea   :  { %261 = vmatpush1.msra.mxu1 %v233_v30 }
  0xeb   :  { %262 = vmatprep.subr.mxu1 %v232_v31 }
  0xec   :  { %263 = vmatpush1.msra.mxu1 %v231_v32 }
  0xed   :  { %264 = vmatprep.subr.mxu1 %v230_v33 }
  0xee   :  { %265 = vmatpush1.msra.mxu1 %v229_v34 }
  0xef   :  { %266 = vmatprep.subr.mxu1 %v228_v35 }
  0xf0   :  { %267 = vmatpush1.msra.mxu1 %v227_v36 }
  0xf1   :  { %268 = vmatprep.subr.mxu1 %v226_v37 }
  0xf2   :  { %269 = vmatpush1.msra.mxu1 %v225_v38 }
  0xf3   :  { %270 = vmatprep.subr.mxu1 %v224_v39 }
  0xf4   :  { %271 = vmatpush1.msra.mxu1 %v223_v40 }
  0xf5   :  { %272 = vmatprep.subr.mxu1 %v222_v41 }
  0xf6   :  { %273 = vmatpush1.msra.mxu1 %v221_v42 }
 0x1a7   :  { %v214_v43 = vpop.f32.mrf.mxu1 }
 0x1a8   :  { %219 = vrot.lane.b32.xlu0 %v214_v43, %s396_s9  ;;  %335 = vmatmul.mubr.msk.f32.vlgmr.msra.gmra.mxu1 %vm237_vm5, %v214_v43 }
 0x1a9   :  { %v390_v44 = vpop.f32.mrf.mxu1  ;;  %312 = vmatprep.mubr.f32.mxu1 %v394_v0 }
 0x21a   :  { %v220_v45 = vpop.permute.xlu0 %219 }
 0x21b   :  { %336 = vmatmul.mubr.msk.f32.gmra.mxu1 %vm237_vm5, %v220_v45 }
 0x268   :  { %v308_v46 = vpop.f32.mrf.mxu1 }
 0x269   :  { %319 = vst [vmem:[%s537_s3] sm:$0xff] %v308_v46 }
 0x26a   :  { %v310_v47 = vpop.f32.mrf.mxu1 }
 0x26b   :  { %320 = vst [vmem:[%s537_s3 + $0x8] sm:$0xff] %v310_v47 }
 0x2db   :  { %v314_v48 = vpop.f32.mrf.mxu1 }
 0x2dc   :  { %321 = vst [vmem:[%s537_s3 + $0x10] sm:$0xff] %v314_v48 }
 0x2dd   :  { %v316_v49 = vpop.f32.mrf.mxu1 }
 0x2de   :  { %322 = vst [vmem:[%s537_s3 + $0x18] sm:$0xff] %v316_v49 }

</bundles_post_ra>
